<compile_context>
chip_gen: v7x
topology: tpu7x:2x2x1
jax: 0.10.0
libtpu: 0.0.40
codegen_flags: <defaults>
</compile_context>

<pallas_src>
from functools import partial

import numpy as np
import jax
import jax.numpy as jnp
from jax.experimental import pallas as pl
from jax.experimental.pallas import tpu as pltpu


def _flatten_kernel(vc_ref, aux_ref, expand_ref, out_ref, *, vbits, daux):
    """Processes one (TM, .) row tile.

    vc_ref:     (TM, P)          uint8    raw viewcone bytes
    aux_ref:    (TM, daux)       float32  [direction | scout | location]
    expand_ref: (P, vbits)       float32  expansion matrix, E[p, 8p+b] = 2^-b
    out_ref:    (TM, vbits+daux) float32
    """
    vc_f = vc_ref[...].astype(jnp.int32).astype(jnp.float32)            # (TM, P)
    # MXU: replicate each byte into its 8 bit slots, pre-scaled by 2^-b (exact in f32).
    shifted = jnp.dot(vc_f, expand_ref[...],
                      preferred_element_type=jnp.float32)               # (TM, vbits)
    # trunc-toward-zero == floor for non-negative values, so (i32)(v * 2^-b) & 1 == bit b.
    bits = jnp.bitwise_and(shifted.astype(jnp.int32), 1).astype(jnp.float32)
    out_ref[:, 0:vbits] = bits                                          # lane-dense store
    out_ref[:, vbits:vbits + daux] = aux_ref[...]                       # one small store


def _row_tile(n):
    """Whole array for small N (single block), else a 256/512 row tile (mult. of 32)."""
    if n <= 256:
        return n
    return 512 if n >= 512 else 256


def scout_guard_flatten(viewcone, direction, scout, location):
    """JAX/Pallas equivalent of ScoutGuardFlatten.forward.

    viewcone : (B, A, H, W) uint8
    direction: (B, A, Dd)
    scout    : (B, A, Ds)
    location : (B, A, Dl) or (B, Dl)
    returns  : (B, A, H*W*8 + Dd + Ds + Dl) float32
    """
    B, A = viewcone.shape[:2]
    P = int(np.prod(viewcone.shape[2:]))          # pixels per agent
    vbits = 8 * P
    N = B * A

    # --- aux features: cast to float32 (matches .float(); no integer truncation) and
    #     coalesce into a single tiny (N, daux) array => one DMA + one store in-kernel.
    if location.ndim == 2:
        # PyTorch unsqueezes to (B, 1, Dl); broadcasting across agents keeps the concat
        # well-defined for A > 1 (torch.cat would require A == 1 in that path).
        location = jnp.broadcast_to(location[:, None, :], (B, A, location.shape[-1]))
    aux = jnp.concatenate(
        [direction.reshape(B, A, -1).astype(jnp.float32),
         scout.reshape(B, A, -1).astype(jnp.float32),
         location.astype(jnp.float32)],
        axis=-1).reshape(N, -1)
    daux = aux.shape[-1]
    F = vbits + daux

    # --- compact viewcone bytes; the reshape is a free contiguous view (no HBM pass).
    vc = viewcone.reshape(N, P).astype(jnp.uint8)

    # --- constant expansion matrix: E[p, 8p+b] = 2^-b  (one-hot per output column).
    cols = np.arange(vbits)
    E = np.zeros((P, vbits), dtype=np.float32)
    E[cols // 8, cols] = (2.0 ** (-(cols % 8))).astype(np.float32)
    expand = jnp.asarray(E)

    tm = _row_tile(N)
    grid = (pl.cdiv(N, tm),)

    cost = pl.CostEstimate(
        flops=2 * N * P * vbits + 4 * N * F,
        transcendentals=0,
        bytes_accessed=N * P + 4 * (N * daux + P * vbits + N * F),
    )

    out = pl.pallas_call(
        partial(_flatten_kernel, vbits=vbits, daux=daux),
        out_shape=jax.ShapeDtypeStruct((N, F), jnp.float32),
        grid=grid,
        in_specs=[
            pl.BlockSpec((tm, P), lambda i: (i, 0)),         # uint8 viewcone rows
            pl.BlockSpec((tm, daux), lambda i: (i, 0)),      # coalesced aux rows
            pl.BlockSpec((P, vbits), lambda i: (0, 0)),      # resident constant (39 KiB)
        ],
        out_specs=pl.BlockSpec((tm, F), lambda i: (i, 0)),
        compiler_params=pltpu.CompilerParams(dimension_semantics=("parallel",)),
        cost_estimate=cost,
    )(vc, aux, expand)

    return out.reshape(B, A, F)


def _reference(viewcone, direction, scout, location):
    """NumPy port of the PyTorch forward for verification."""
    bits = np.arange(8, dtype=np.uint8)
    bv = ((viewcone[..., None].astype(np.int32) >> bits) & 1).astype(np.float32)
    B, A = viewcone.shape[:2]
    flat_v = bv.reshape(B, A, -1)
    d = direction.astype(np.float32)
    s = scout.astype(np.float32)
    loc = location.astype(np.float32)
    if loc.ndim == 2:
        loc = np.broadcast_to(loc[:, None, :], (B, A, loc.shape[-1]))
    return np.concatenate([flat_v, d, s, loc], axis=-1)


if __name__ == "__main__":
    key = jax.random.PRNGKey(0)
    k1, k2, k3, k4 = jax.random.split(key, 4)

    B, A, H, W = 2, 4, 7, 5                       # small viewcone grid per agent
    viewcone = jax.random.randint(k1, (B, A, H, W), 0, 256, dtype=jnp.int32).astype(jnp.uint8)
    direction = jax.random.randint(k2, (B, A, 1), 0, 4, dtype=jnp.int32)
    scout = jax.random.randint(k3, (B, A, 1), 0, 2, dtype=jnp.int32)
    location = jax.random.randint(k4, (B, A, 2), 0, 16, dtype=jnp.int32)

    out = scout_guard_flatten(viewcone, direction, scout, location)
    jax.block_until_ready(out)

    ref = _reference(np.asarray(viewcone), np.asarray(direction),
                     np.asarray(scout), np.asarray(location))
    assert out.shape == (B, A, H * W * 8 + 1 + 1 + 2), out.shape
    np.testing.assert_allclose(np.asarray(out), ref, rtol=0, atol=0)

    print("KERNEL_OK")
</pallas_src>

<mosaic_0001>
module attributes {stable_mosaic.version = 11 : i64} {
  func.func @_flatten_kernel(%arg0: i32, %arg1: memref<8x35xi8, #tpu.memory_space<vmem>>, %arg2: memref<8x4xf32, #tpu.memory_space<vmem>>, %arg3: memref<35x280xf32, #tpu.memory_space<vmem>>, %arg4: memref<8x284xf32, #tpu.memory_space<vmem>>) attributes {dimension_semantics = [#tpu.dimension_semantics<parallel>], iteration_bounds = array<i64: 1>, scalar_prefetch = 0 : i64, scratch_operands = 0 : i64, tpu.core_type = #tpu.core_type<tc>, window_params = [{transform_indices = @transform_0, window_bounds = array<i64: 8, 35>}, {transform_indices = @transform_1, window_bounds = array<i64: 8, 4>}, {pipeline_mode = #tpu.pipeline_mode<synchronous>, transform_indices = @transform_2, window_bounds = array<i64: 35, 280>}, {transform_indices = @transform_3, window_bounds = array<i64: 8, 284>}]} {
    %c0 = arith.constant 0 : index
    %c0_0 = arith.constant 0 : index
    %0 = vector.load %arg1[%c0, %c0_0] : memref<8x35xi8, #tpu.memory_space<vmem>>, vector<8x35xi8>
    %1 = arith.extui %0 : vector<8x35xi8> to vector<8x35xi32>
    %2 = arith.sitofp %1 : vector<8x35xi32> to vector<8x35xf32>
    %c0_1 = arith.constant 0 : index
    %c0_2 = arith.constant 0 : index
    %3 = vector.load %arg3[%c0_1, %c0_2] : memref<35x280xf32, #tpu.memory_space<vmem>>, vector<35x280xf32>
    %cst = arith.constant dense<0.000000e+00> : vector<8x280xf32>
    %4 = tpu.matmul %2, %3, %cst {dimension_numbers = #tpu.dot_dimension_numbers<[1], [0], [0], [1], [0, 0, 1, 1], [], []>} : vector<8x35xf32>, vector<35x280xf32>, vector<8x280xf32> -> vector<8x280xf32>
    %5 = arith.fptosi %4 : vector<8x280xf32> to vector<8x280xi32>
    %c1_i32 = arith.constant 1 : i32
    %6 = vector.broadcast %c1_i32 : i32 to vector<8x280xi32>
    %7 = arith.andi %5, %6 : vector<8x280xi32>
    %8 = arith.sitofp %7 : vector<8x280xi32> to vector<8x280xf32>
    %c0_3 = arith.constant 0 : index
    %c0_4 = arith.constant 0 : index
    %9 = vector.load %arg4[%c0_3, %c0_4] : memref<8x284xf32, #tpu.memory_space<vmem>>, vector<8x280xf32>
    tpu.vector_store %arg4[%c0_3, %c0_4], %8 {strides = array<i32>} : memref<8x284xf32, #tpu.memory_space<vmem>>, vector<8x280xf32>,
    %c0_5 = arith.constant 0 : index
    %c0_6 = arith.constant 0 : index
    %10 = vector.load %arg2[%c0_5, %c0_6] : memref<8x4xf32, #tpu.memory_space<vmem>>, vector<8x4xf32>
    %c0_7 = arith.constant 0 : index
    %c280 = arith.constant 280 : index
    %11 = vector.load %arg4[%c0_7, %c280] : memref<8x284xf32, #tpu.memory_space<vmem>>, vector<8x4xf32>
    tpu.vector_store %arg4[%c0_7, %c280], %10 {strides = array<i32>} : memref<8x284xf32, #tpu.memory_space<vmem>>, vector<8x4xf32>,
    return
  }
  func.func @transform_0(%arg0: i32) -> (i32, i32) {
    %c0_i32 = arith.constant 0 : i32
    %c0_i32_0 = arith.constant 0 : i32
    return %arg0, %c0_i32 : i32, i32
  }
  func.func @transform_1(%arg0: i32) -> (i32, i32) {
    %c0_i32 = arith.constant 0 : i32
    %c0_i32_0 = arith.constant 0 : i32
    return %arg0, %c0_i32 : i32, i32
  }
  func.func @transform_2(%arg0: i32) -> (i32, i32) {
    %c0_i32 = arith.constant 0 : i32
    %c0_i32_0 = arith.constant 0 : i32
    %c0_i32_1 = arith.constant 0 : i32
    return %c0_i32, %c0_i32_0 : i32, i32
  }
  func.func @transform_3(%arg0: i32) -> (i32, i32) {
    %c0_i32 = arith.constant 0 : i32
    %c0_i32_0 = arith.constant 0 : i32
    return %arg0, %c0_i32 : i32, i32
  }
}

</mosaic_0001>

<bundles_post_ra>
// kernel: tpu_custom_call.1
= control target key start
LH: loop header
LB: loop body
LE: loop exit
PB: predicated region body
PF: predicated region fallthrough
CT: control target
= control target key end

     0   :  { %8 = vsyncpa [#allocation3], 0  ;;  %s396_s0 = inlined_call_operand.vmem [shape: u8[8,35], index: 0, kind: input, shape index: {}]   ;;  %s397_s1 = inlined_call_operand.vmem [shape: f32[8,4], index: 1, kind: input, shape index: {}]   ;;  %s398_s2 = inlined_call_operand.hbm [shape: f32[35,280], index: 2, kind: input, shape index: {}]   ;;  %s399_s3 = inlined_call_operand.hbm [shape: f32[8,284], index: 3, kind: output, shape index: {}]  }
   0x1   :  { %9 = vsyncpa [#allocation4], 0  ;;  %s337_s12 = smov [#allocation2]   ;;  %s289_s16 = scalar_lea.hbm %s398_s2, 1920 }
   0x2   :  { %s19_s13 = sshll.u32 %s337_s12, 4  ;;  %p290_p0 = scmp.ne.s32.totalorder %s398_s2, %s289_s16  ;;  %s20_s13 = int_to_ptr.vmem [resolvable:$true] %s19_s13 }
   0x3   :  { %p293_p1 = scmp.lt.u32.totalorder %s289_s16, %s398_s2 }
   0x5   :  { %p295_p2 = pnand %p293_p1, %p290_p0 }
   0x7   :  { %298 = shalt.err (!%p295_p2)
}
   0x8   :  { %s299_s21 = scalar_lea.vmem %s20_s13, 1920  ;;  %p304_p4 = scmp.lt.s32.totalorder %s20_s13, %s20_s13 }
   0x9   :  { %p300_p3 = scmp.ne.s32.totalorder %s20_s13, %s299_s21  ;;  %p305_p5 = scmp.lt.s32.totalorder %s299_s21, %s299_s21 }
   0xb   :  { %p306_p6 = por %p305_p5, %p304_p4 }
   0xd   :  { %p307_p7 = pnand %p306_p6, %p300_p3 }
   0xf   :  { %310 = shalt.err (!%p307_p7)
}
  0x10   :  { %s338_s22 = smov 384   ;;  %s339_s23 = smov 24  }
  0x11   :  { %25 = dma.hbm_to_vmem [thread:$0]  %s398_s2, 1920, %s20_s13, [#allocation3], %s338_s22, %s338_s22, %s339_s23  }
  0x12   :  { %333 = dma.done.wait [#allocation3], 1920  }
  0x13   :  { %334 = vsyncadd [#allocation3], 4294965376  ;;  %v340_v0 = vmov 0.0|0.0   ;;  %vm341_vm0 = vmmov 0   ;;  %v342_v1 = vmov 0.0   ;;  %v34_v2 = vld [vmem:[#allocation2 + $0x8] sm:$0xff] }
  0x14   :  { %270 = vmatprep.subr.bf16.mxu1 %v340_v0  ;;  %259 = vmatprep.mubr.msk.f32.mxu1 %vm341_vm0, %v342_v1  ;;  %v37_v3 = vld [vmem:[#allocation2 + $0x20] sm:$0xff]  ;;  %v35_v4 = vld [vmem:[#allocation2 + $0x10] sm:$0xff]  ;;  %v38_v6 = vld [vmem:[#allocation2 + $0x28] sm:$0xff]  ;;  %vm52_vm1 = vcmask 1042432   ;;  %vm48_vm2 = vcmask 285696   ;;  %vm214_vm3 = vcmask 195584  }
  0x15   :  { %126 = vmatprep.mubr.f32.mxu0 %v342_v1  ;;  %v262_v5 = vpack.c.bf16 %v37_v3, %v34_v2  ;;  %v33_v7 = vld [vmem:[#allocation2] sm:$0xff]  ;;  %v36_v8 = vld [vmem:[#allocation2 + $0x18] sm:$0xff]  ;;  %v271_v9 = vpack.c.bf16 %v38_v6, %v35_v4  ;;  %v43_v12 = vld [vmem:[#allocation2 + $0x50] sm:$0xff]  ;;  %vm221_vm4 = vcmask 228544  }
  0x16   :  { %v264_v10 = vpack.c.bf16 %v36_v8, %v33_v7  ;;  %v40_v11 = vld [vmem:[#allocation2 + $0x38] sm:$0xff]  ;;  %v41_v13 = vld [vmem:[#allocation2 + $0x40] sm:$0xff]  ;;  %v39_v16 = vld [vmem:[#allocation2 + $0x30] sm:$0xff] }
  0x17   :  { %263 = vmatprep.subr.bf16.mxu0 %v262_v5  ;;  %v266_v14 = vpack.c.bf16 %v43_v12, %v40_v11  ;;  %v44_v15 = vld [vmem:[#allocation2 + $0x58] sm:$0xff]  ;;  %v42_v17 = vld [vmem:[#allocation2 + $0x48] sm:$0xff]  ;;  %272 = vmatpush3.bf16.msra.mxu1 %v271_v9  ;;  %v29_v20 = vld [vmem:[%s396_s0] sm:$0x3]  ;;  %s343_s0 = smov [#allocation5]  }
  0x18   :  { %265 = vmatpush1.bf16.msra.mxu0 %v264_v10  ;;  %v274_v18 = vpack.c.bf16 %v44_v15, %v41_v13  ;;  %v268_v19 = vpack.c.bf16 %v42_v17, %v39_v16  ;;  %273 = vmatprep.subr.bf16.mxu1 %v340_v0  ;;  %v216_v21 = vld [vmem:[%s397_s1] sm:$0xff]  ;;  %v46_v22 = vld [vmem:[#allocation2 + $0x68] sm:$0x7]  ;;  %v30_v23 = vunpack.c.0.s8 %v29_v20  ;;  %v47_v25 = vld [vmem:[#allocation2 + $0x70] sm:$0x7]  ;;  %s229_s1 = sshll.u32 %s343_s0, 4  ;;  %s230_s1 = int_to_ptr.vmem [resolvable:$true] %s229_s1 }
  0x19   :  { %267 = vmatprep.subr.bf16.mxu0 %v266_v14  ;;  %218 = vrot.lane.b32.xlu0 %v216_v21, %s339_s23  ;;  %v45_v26 = vld [vmem:[#allocation2 + $0x60] sm:$0x7]  ;;  %s311_s29 = scalar_lea.vmem %s230_s1, 384  ;;  %p316_p9 = scmp.lt.s32.totalorder %s230_s1, %s230_s1 }
  0x1a   :  { %v31_v24 = vand.u32 255, %v30_v23  ;;  %p312_p8 = scmp.ne.s32.totalorder %s230_s1, %s311_s29  ;;  %p317_p10 = scmp.lt.s32.totalorder %s311_s29, %s311_s29 }
  0x1b   :  { %275 = vmatpush3.bf16.msra.mxu1 %v274_v18 }
  0x1c   :  { %269 = vmatpush1.bf16.msra.mxu0 %v268_v19  ;;  %257 = vmatprep.subr.mxu1 %v342_v1  ;;  %v32_v27 = vcvt.s32.f32 %v31_v24  ;;  %p318_p11 = por %p317_p10, %p316_p9 }
  0x1d   :  { %238 = vmatprep.subr.msk.mxu0 %vm52_vm1, %v46_v22 }
  0x1e   :  { %p319_p12 = pnand %p318_p11, %p312_p8 }
  0x1f   :  { %258 = vmatpush3.msk.msra.mxu1 %vm52_vm1, %v47_v25 }
  0x20   :  { %239 = vmatpush1.msk.msra.mxu0 %vm52_vm1, %v45_v26  ;;  %260 = vmatmul.mubr.msk.f32.vlgmr.msra.gmra.mrb[0].mxu1 %vm48_vm2, %v32_v27 }
  0x21   :  { %240 = vmatmul.mubr.msk.f32.vlgmr.msra.gmra.mrb[0].mxu0 %vm48_vm2, %v32_v27 }
  0x8b   :  { %v219_v43 = vpop.permute.xlu0 %218 }
  0xf3   :  { %v199_v28 = vpop.f32.mrb[0].mxu1 }
  0xf4   :  { %v128_v29 = vpop.f32.mrb[0].mxu0  ;;  %v280_v30 = vtrunc.f32 %v199_v28  ;;  %v261_v32 = vpop.f32.mrb[1].mxu1 }
  0xf5   :  { %v276_v31 = vtrunc.f32 %v128_v29  ;;  %v130_v33 = vpop.f32.mrb[1].mxu0 }
  0xf6   :  { %v278_v34 = vtrunc.f32 %v130_v33  ;;  %v281_v35 = vcvt.f32.s32 %v280_v30 }
  0xf7   :  { %v277_v36 = vcvt.f32.s32 %v276_v31 }
  0xf8   :  { %v279_v37 = vcvt.f32.s32 %v278_v34  ;;  %v208_v38 = vand.u32 1, %v281_v35 }
  0xf9   :  { %v206_v39 = vand.u32 1, %v277_v36 }
  0xfa   :  { %v207_v40 = vand.u32 1, %v279_v37  ;;  %v211_v41 = vcvt.s32.f32 %v208_v38 }
  0xfb   :  { %v209_v42 = vcvt.s32.f32 %v206_v39 }
  0xfc   :  { %v210_v44 = vcvt.s32.f32 %v207_v40  ;;  %215 = vst.msk [vmem:[#allocation5 + $0x10] sm:$0xff] %vm214_vm3, %v211_v41 }
  0xfd   :  { %212 = vst [vmem:[#allocation5] sm:$0xff] %v209_v42  ;;  %222 = vst.msk [vmem:[#allocation5 + $0x10] sm:$0xff] %vm221_vm4, %v219_v43 }
  0xfe   :  { %213 = vst [vmem:[#allocation5 + $0x8] sm:$0xff] %v210_v44 }
  0xff   :  { %322 = shalt.err (!%p319_p12)
}
 0x100   :  { %s323_s5 = scalar_lea.hbm %s399_s3, 384 }
 0x101   :  { %p324_p13 = scmp.ne.s32.totalorder %s399_s3, %s323_s5  ;;  %p327_p0 = scmp.lt.u32.totalorder %s323_s5, %s399_s3 }
 0x103   :  { %p329_p1 = pnand %p327_p0, %p324_p13 }
 0x105   :  { %332 = shalt.err (!%p329_p1)
}
 0x106   :  { %232 = dma.vmem_to_hbm [thread:$0]  %s230_s1, 384, %s399_s3, [#allocation4]  }
 0x107   :  { %335 = dma.done.wait [#allocation4], 384  }
 0x108   :  { %336 = vsyncadd [#allocation4], 4294966912 }
 0x109   :  { %236 = vsyncpa [#allocation3], 1 }
 0x10a   :  { %237 = vsyncpa [#allocation4], 1 }

</bundles_post_ra>
